<compile_context>
chip_gen: v5e
topology: v5e:2x2
jax: 0.10.0
libtpu: 0.0.40
codegen_flags: <defaults>
</compile_context>

<pallas_src>
import functools

import jax
import jax.numpy as jnp
from jax.experimental import pallas as pl
from jax.experimental.pallas import tpu as pltpu


def _attention3d_kernel(x_ref, w1_ref, w2_ref, o_ref, acc_ref, *,
                        inv_spatial, inv_temperature):
    # x_ref  : (b_tile, C, s_tile)  activation tile (C on sublanes, spatial on lanes)
    # w1_ref : (C, H1)   fc1 weight (pre-transposed), VMEM-resident across the S sweep
    # w2_ref : (H1, K)   fc2 weight (pre-transposed), VMEM-resident across the S sweep
    # o_ref  : (1, b_tile, K)       per-batch-tile output slab
    # acc_ref: (b_tile, C, s_tile)  f32 lane-resident partial-sum accumulator
    s = pl.program_id(1)

    @pl.when(s == 0)
    def _():
        acc_ref[...] = jnp.zeros_like(acc_ref)

    # AdaptiveAvgPool3d(1) partial sums.  Pure VALU: one vadd per streamed vreg
    # (no per-tile cross-lane reduce -> XLU slot stays free, kernel stays
    # HBM-bound).  f32 accumulation also covers bf16 inputs.  The accumulator is
    # kept tile-wide (instead of 128 lanes) so this add needs no reshape/slicing;
    # the extra f32 tile is accounted for in the VMEM budget.
    acc_ref[...] += x_ref[...].astype(jnp.float32)

    # Single XLU reduce + tiny MLP + softmax run once, on the final S step; the
    # output store only happens here (no per-tile writeback).
    @pl.when(s == pl.num_programs(1) - 1)
    def _():
        pooled = jnp.sum(acc_ref[...], axis=-1) * inv_spatial             # (b_tile, C)

        # fc1 (1x1x1 conv, no bias) + ReLU -> (b_tile, H1)
        h = jnp.dot(pooled, w1_ref[...], preferred_element_type=jnp.float32)
        h = jnp.maximum(h, 0.0)

        # fc2 (1x1x1 conv, no bias) -> (b_tile, K), temperature scaling
        logits = jnp.dot(h, w2_ref[...], preferred_element_type=jnp.float32)
        logits = logits * inv_temperature

        # Softmax over K (max-subtracted), exact division (correctness fix).
        m = jnp.max(logits, axis=1, keepdims=True)
        e = jnp.exp(logits - m)
        denom = jnp.sum(e, axis=1, keepdims=True)
        o_ref[0] = (e / denom).astype(o_ref.dtype)


def _vmem_plan():
    """Generation-aware (tile_budget_bytes, vmem_limit_bytes)."""
    try:
        cap = pltpu.get_tpu_info().vmem_capacity_bytes
    except Exception:
        cap = 64 * 1024 * 1024                      # conservative: v7x per-TC VMEM
    if cap >= 96 * 1024 * 1024:                     # v5e / v6e: 128 MiB physical
        return 48 * 1024 * 1024, 80 * 1024 * 1024
    return 24 * 1024 * 1024, 44 * 1024 * 1024       # v7x: 64 MiB per TC


def _choose_b_tile(B):
    """Largest divisor of B (capped at 8) that still leaves >=2 batch tiles, so
    the 'parallel' grid axis can be sharded across v7x's two TensorCores while
    keeping block height modest (longer contiguous s_tile DMA rows)."""
    best = 1
    for bt in range(1, min(B, 8) + 1):
        if B % bt == 0 and (B // bt >= 2 or B == 1):
            best = bt
    return best


def _choose_s_tile(S_pad, b_tile, C, in_itemsize, budget_bytes):
    """Largest multiple of 128 dividing S_pad whose VMEM working set
    (double-buffered x tile + tile-wide f32 accumulator) fits in budget_bytes."""
    C_pad = ((C + 7) // 8) * 8                       # sublane padding when C % 8 != 0
    per_s = b_tile * C_pad * (2 * in_itemsize + 4)   # 2x input buffers + f32 acc
    max_s = max(128, (budget_bytes // per_s) // 128 * 128)
    s_tile = min(S_pad, max_s)
    while S_pad % s_tile:
        s_tile -= 128
    return s_tile


def attention3d_forward(x_ncdhw, w1, w2, temperature):
    """x_ncdhw: (B, C, D, H, W) activations.
    w1: (H1, C) fc1 Conv3d 1x1x1 weight (spatial dims squeezed).
    w2: (K, H1) fc2 Conv3d 1x1x1 weight (spatial dims squeezed)."""
    B, C, D, H, W = x_ncdhw.shape
    S = D * H * W
    H1 = w1.shape[0]
    K = w2.shape[0]

    # Zero-copy relayout NCDHW -> (B, C, S).  Pad S up to a multiple of 128 with
    # zeros (sum unaffected; we divide by the true S) so every tile is a fixed
    # 128-multiple: double-buffering and VMEM stay bounded on all generations.
    x_bcs = x_ncdhw.reshape(B, C, S)
    S_pad = ((S + 127) // 128) * 128
    if S_pad != S:
        x_bcs = jnp.pad(x_bcs, ((0, 0), (0, 0), (0, S_pad - S)))

    w1_t = jnp.transpose(w1, (1, 0))   # (C, H1)  tiny, one-time
    w2_t = jnp.transpose(w2, (1, 0))   # (H1, K)  tiny, one-time

    tile_budget, vmem_limit = _vmem_plan()
    b_tile = _choose_b_tile(B)
    s_tile = _choose_s_tile(S_pad, b_tile, C, x_bcs.dtype.itemsize, tile_budget)
    num_b_tiles = B // b_tile
    grid = (num_b_tiles, S_pad // s_tile)

    kernel = functools.partial(
        _attention3d_kernel,
        inv_spatial=1.0 / float(S),
        inv_temperature=1.0 / float(temperature),
    )

    out = pl.pallas_call(
        kernel,
        # (num_b_tiles, b_tile, K): the output block's last two dims are full
        # extents, so b_tile is not constrained by the (8,128) rule.
        out_shape=jax.ShapeDtypeStruct((num_b_tiles, b_tile, K), jnp.float32),
        grid_spec=pltpu.PrefetchScalarGridSpec(
            num_scalar_prefetch=0,
            grid=grid,
            in_specs=[
                # x: tiled over (batch, spatial-reduction); spatial is the last,
                # "arbitrary" grid axis.
                pl.BlockSpec((b_tile, C, s_tile), lambda b, s: (b, 0, s)),
                # weights: constant index_map -> VMEM-resident across the S sweep
                pl.BlockSpec((C, H1), lambda b, s: (0, 0)),
                pl.BlockSpec((H1, K), lambda b, s: (0, 0)),
            ],
            # output block constant along the reduction axis -> stored once per b
            out_specs=pl.BlockSpec((1, b_tile, K), lambda b, s: (b, 0, 0)),
            scratch_shapes=[pltpu.VMEM((b_tile, C, s_tile), jnp.float32)],
        ),
        compiler_params=pltpu.CompilerParams(
            dimension_semantics=("parallel", "arbitrary"),
            vmem_limit_bytes=vmem_limit,
        ),
    )(x_bcs, w1_t, w2_t)

    return out.reshape(B, K)


def attention3d_reference(x_ncdhw, w1, w2, temperature):
    pooled = jnp.mean(x_ncdhw, axis=(2, 3, 4))           # (B, C)
    h = jnp.maximum(pooled @ w1.T, 0.0)                  # (B, H1)
    logits = (h @ w2.T) / temperature                    # (B, K)
    return jax.nn.softmax(logits, axis=1)


if __name__ == "__main__":
    # Module config: in_channels=4, ratios=0.25 -> hidden_planes = int(4*0.25)+1 = 2
    # K = 4 experts, temperature = 4 (satisfies temperature % 3 == 1).
    B, C, D, H, W = 2, 4, 4, 4, 4
    ratios = 0.25
    K = 4
    temperature = 4
    hidden_planes = int(C * ratios) + 1 if C != 3 else K

    key = jax.random.PRNGKey(0)
    kx, k1, k2 = jax.random.split(key, 3)

    x = jax.random.normal(kx, (B, C, D, H, W), dtype=jnp.float32)
    # Conv3d weights (kernel size 1, no bias): (out_ch, in_ch, 1, 1, 1) -> spatial squeezed.
    w1 = jax.random.normal(k1, (hidden_planes, C), dtype=jnp.float32) * 0.5   # fc1
    w2 = jax.random.normal(k2, (K, hidden_planes), dtype=jnp.float32) * 0.5   # fc2

    out = attention3d_forward(x, w1, w2, temperature)
    out = jax.block_until_ready(out)

    ref = attention3d_reference(x, w1, w2, temperature)
    assert out.shape == (B, K)
    assert jnp.allclose(out, ref, atol=1e-5, rtol=1e-5), (out, ref)
    assert jnp.allclose(jnp.sum(out, axis=1), 1.0, atol=1e-5)

    print("KERNEL_OK")
</pallas_src>

<mosaic_0001>
module attributes {stable_mosaic.version = 11 : i64} {
  func.func @_attention3d_kernel(%arg0: i32, %arg1: i32, %arg2: memref<1x4x128xf32, #tpu.memory_space<vmem>>, %arg3: memref<4x2xf32, #tpu.memory_space<vmem>>, %arg4: memref<2x4xf32, #tpu.memory_space<vmem>>, %arg5: memref<1x1x4xf32, #tpu.memory_space<vmem>>, %arg6: memref<1x4x128xf32, #tpu.memory_space<vmem>>) attributes {dimension_semantics = [#tpu.dimension_semantics<parallel>, #tpu.dimension_semantics<arbitrary>], iteration_bounds = array<i64: 2, 1>, scalar_prefetch = 0 : i64, scratch_operands = 1 : i64, tpu.core_type = #tpu.core_type<tc>, window_params = [{transform_indices = @transform_0, window_bounds = array<i64: 1, 4, 128>}, {pipeline_mode = #tpu.pipeline_mode<synchronous>, transform_indices = @transform_1, window_bounds = array<i64: 4, 2>}, {pipeline_mode = #tpu.pipeline_mode<synchronous>, transform_indices = @transform_2, window_bounds = array<i64: 2, 4>}, {transform_indices = @transform_3, window_bounds = array<i64: 1, 1, 4>}]} {
    %c0_i32 = arith.constant 0 : i32
    %0 = arith.cmpi eq, %arg1, %c0_i32 : i32
    %1 = arith.extui %0 : i1 to i32
    %c0_i32_0 = arith.constant 0 : i32
    %2 = arith.cmpi ne, %1, %c0_i32_0 : i32
    scf.if %2 {
      %cst = arith.constant 0.000000e+00 : f32
      %10 = vector.broadcast %cst : f32 to vector<1x4x128xf32>
      %c0_11 = arith.constant 0 : index
      %c0_12 = arith.constant 0 : index
      %c0_13 = arith.constant 0 : index
      %11 = vector.load %arg6[%c0_11, %c0_12, %c0_13] : memref<1x4x128xf32, #tpu.memory_space<vmem>>, vector<1x4x128xf32>
      tpu.vector_store %arg6[%c0_11, %c0_12, %c0_13], %10 {strides = array<i32>} : memref<1x4x128xf32, #tpu.memory_space<vmem>>, vector<1x4x128xf32>,
    } else {
    }
    %c0 = arith.constant 0 : index
    %c0_1 = arith.constant 0 : index
    %c0_2 = arith.constant 0 : index
    %3 = vector.load %arg6[%c0, %c0_1, %c0_2] : memref<1x4x128xf32, #tpu.memory_space<vmem>>, vector<1x4x128xf32>
    %c0_3 = arith.constant 0 : index
    %c0_4 = arith.constant 0 : index
    %c0_5 = arith.constant 0 : index
    %4 = vector.load %arg2[%c0_3, %c0_4, %c0_5] : memref<1x4x128xf32, #tpu.memory_space<vmem>>, vector<1x4x128xf32>
    %5 = arith.addf %3, %4 : vector<1x4x128xf32>
    %c0_6 = arith.constant 0 : index
    %c0_7 = arith.constant 0 : index
    %c0_8 = arith.constant 0 : index
    %6 = vector.load %arg6[%c0_6, %c0_7, %c0_8] : memref<1x4x128xf32, #tpu.memory_space<vmem>>, vector<1x4x128xf32>
    tpu.vector_store %arg6[%c0_6, %c0_7, %c0_8], %5 {strides = array<i32>} : memref<1x4x128xf32, #tpu.memory_space<vmem>>, vector<1x4x128xf32>,
    %c0_i32_9 = arith.constant 0 : i32
    %7 = arith.cmpi eq, %arg1, %c0_i32_9 : i32
    %8 = arith.extui %7 : i1 to i32
    %c0_i32_10 = arith.constant 0 : i32
    %9 = arith.cmpi ne, %8, %c0_i32_10 : i32
    scf.if %9 {
      %c0_11 = arith.constant 0 : index
      %c0_12 = arith.constant 0 : index
      %c0_13 = arith.constant 0 : index
      %10 = vector.load %arg6[%c0_11, %c0_12, %c0_13] : memref<1x4x128xf32, #tpu.memory_space<vmem>>, vector<1x4x128xf32>
      %cst = arith.constant dense<0.000000e+00> : vector<1x4xf32>
      %11 = vector.multi_reduction <add>, %10, %cst [2] : vector<1x4x128xf32> to vector<1x4xf32>
      %cst_14 = arith.constant 1.562500e-02 : f32
      %12 = vector.broadcast %cst_14 : f32 to vector<1x4xf32>
      %13 = arith.mulf %11, %12 : vector<1x4xf32>
      %c0_15 = arith.constant 0 : index
      %c0_16 = arith.constant 0 : index
      %14 = vector.load %arg3[%c0_15, %c0_16] : memref<4x2xf32, #tpu.memory_space<vmem>>, vector<4x2xf32>
      %cst_17 = arith.constant dense<0.000000e+00> : vector<1x2xf32>
      %15 = tpu.matmul %13, %14, %cst_17 {dimension_numbers = #tpu.dot_dimension_numbers<[1], [0], [0], [1], [0, 0, 1, 1], [], []>} : vector<1x4xf32>, vector<4x2xf32>, vector<1x2xf32> -> vector<1x2xf32>
      %cst_18 = arith.constant 0.000000e+00 : f32
      %16 = vector.broadcast %cst_18 : f32 to vector<1x2xf32>
      %17 = arith.maximumf %15, %16 : vector<1x2xf32>
      %c0_19 = arith.constant 0 : index
      %c0_20 = arith.constant 0 : index
      %18 = vector.load %arg4[%c0_19, %c0_20] : memref<2x4xf32, #tpu.memory_space<vmem>>, vector<2x4xf32>
      %cst_21 = arith.constant dense<0.000000e+00> : vector<1x4xf32>
      %19 = tpu.matmul %17, %18, %cst_21 {dimension_numbers = #tpu.dot_dimension_numbers<[1], [0], [0], [1], [0, 0, 1, 1], [], []>} : vector<1x2xf32>, vector<2x4xf32>, vector<1x4xf32> -> vector<1x4xf32>
      %cst_22 = arith.constant 2.500000e-01 : f32
      %20 = vector.broadcast %cst_22 : f32 to vector<1x4xf32>
      %21 = arith.mulf %19, %20 : vector<1x4xf32>
      %cst_23 = arith.constant dense<0xFF800000> : vector<1xf32>
      %22 = vector.multi_reduction <maximumf>, %21, %cst_23 [1] : vector<1x4xf32> to vector<1xf32>
      %23 = vector.shape_cast %22 : vector<1xf32> to vector<1x1xf32>
      %24 = vector.broadcast %23 : vector<1x1xf32> to vector<1x4xf32>
      %25 = arith.subf %21, %24 : vector<1x4xf32>
      %26 = math.exp %25 : vector<1x4xf32>
      %cst_24 = arith.constant dense<0.000000e+00> : vector<1xf32>
      %27 = vector.multi_reduction <add>, %26, %cst_24 [1] : vector<1x4xf32> to vector<1xf32>
      %28 = vector.shape_cast %27 : vector<1xf32> to vector<1x1xf32>
      %29 = vector.broadcast %28 : vector<1x1xf32> to vector<1x4xf32>
      %30 = arith.divf %26, %29 : vector<1x4xf32>
      %c0_25 = arith.constant 0 : index
      %c0_26 = arith.constant 0 : index
      %c0_27 = arith.constant 0 : index
      %31 = vector.load %arg5[%c0_25, %c0_26, %c0_27] : memref<1x1x4xf32, #tpu.memory_space<vmem>>, vector<1x1x4xf32>
      %32 = vector.shape_cast %31 : vector<1x1x4xf32> to vector<1x4xf32>
      %33 = vector.shape_cast %30 : vector<1x4xf32> to vector<1x1x4xf32>
      tpu.vector_store %arg5[%c0_25, %c0_26, %c0_27], %33 {strides = array<i32>} : memref<1x1x4xf32, #tpu.memory_space<vmem>>, vector<1x1x4xf32>,
    } else {
    }
    return
  }
  func.func @transform_0(%arg0: i32, %arg1: i32) -> (i32, i32, i32) {
    %c0_i32 = arith.constant 0 : i32
    %c0_i32_0 = arith.constant 0 : i32
    return %arg0, %c0_i32, %arg1 : i32, i32, i32
  }
  func.func @transform_1(%arg0: i32, %arg1: i32) -> (i32, i32) {
    %c0_i32 = arith.constant 0 : i32
    %c0_i32_0 = arith.constant 0 : i32
    %c0_i32_1 = arith.constant 0 : i32
    return %c0_i32, %c0_i32_0 : i32, i32
  }
  func.func @transform_2(%arg0: i32, %arg1: i32) -> (i32, i32) {
    %c0_i32 = arith.constant 0 : i32
    %c0_i32_0 = arith.constant 0 : i32
    %c0_i32_1 = arith.constant 0 : i32
    return %c0_i32, %c0_i32_0 : i32, i32
  }
  func.func @transform_3(%arg0: i32, %arg1: i32) -> (i32, i32, i32) {
    %c0_i32 = arith.constant 0 : i32
    %c0_i32_0 = arith.constant 0 : i32
    %c0_i32_1 = arith.constant 0 : i32
    return %arg0, %c0_i32, %c0_i32_0 : i32, i32, i32
  }
}

</mosaic_0001>

<bundles_post_ra>
// kernel: tpu_custom_call.1
= control target key start
LH: loop header
LB: loop body
LE: loop exit
PB: predicated region body
PF: predicated region fallthrough
CT: control target
= control target key end

     0   :  { %8 = vsyncpa [#allocation4], 0  ;;  %s742_s0 = inlined_call_operand.hbm [shape: f32[2,4,128], index: 0, kind: input, shape index: {}]   ;;  %s743_s1 = inlined_call_operand.vmem [shape: f32[4,2], index: 1, kind: input, shape index: {}]   ;;  %s744_s2 = inlined_call_operand.vmem [shape: f32[2,4], index: 2, kind: input, shape index: {}]   ;;  %s745_s3 = inlined_call_operand.hbm [shape: f32[2,1,4], index: 3, kind: output, shape index: {}]  }
   0x1   :  { %10 = vsyncpa [#allocation4 + $0x1], 0 }
   0x2   :  { %11 = vsyncpa [#allocation5], 0 }
   0x3   :  { %13 = vsyncpa [#allocation5 + $0x1], 0  ;;  %s612_s12 = smov 0   ;;  %s614_s13 = smov 0  }
   0x4   :  { %s616_s14 = smov 0   ;;  %s618_s15 = smov 0  }
   0x5   :  { %s620_s16 = smov 0   ;;  %s622_s17 = smov 0  }
   0x6 LB: > { %s396_s18 = sadd.s32 4294967295, %s589_s17   ;;  %s397_s19 = sadd.s32 4294967294, %s589_s17   ;;  %s589_s17 = sphi %s622_s17, %s19_s17   ;;  %s585_s16 = sphi %s620_s16, %s754_s16   ;;  %s581_s15 = sphi %s618_s15, %s753_s15   ;;  %s577_s14 = sphi %s616_s14, %s752_s14   ;;  %s573_s13 = sphi %s614_s13, %s751_s13   ;;  %s569_s12 = sphi %s612_s12, %s750_s12  }
   0x7   : > { %s31_s20 = sadd.s32 1, %s585_s16  ;;  %s40_s21 = sadd.s32 1, %s577_s14 }
   0x8   : > { %p33_p0 = scmp.ge.s32.totalorder %s31_s20, 2  ;;  %p47_p1 = scmp.ne.s32.totalorder %s577_s14, %s573_s13 }
   0x9   : > { %p48_p2 = scmp.eq.s32.totalorder %s589_s17, 0  ;;  %p53_p3 = scmp.ne.s32.totalorder %s573_s13, %s569_s12 }
   0xa   : > { %s756_s20 = smov (%p33_p0, %s31_s20), 0  ;;  %p54_p5 = scmp.eq.s32.totalorder %s396_s18, 0 }
   0xb   : > { %p653_p4 = por %p48_p2, %p47_p1  ;;  %s35_s23 = ssub.s32 %s585_s16, %s756_s20 }
   0xc   : > { %p119_p6 = scmp.eq.s32.totalorder %s396_s18, 1  ;;  %p38_p7 = scmp.eq.s32.totalorder %s35_s23, 0 }
   0xd   : > { %p659_p8 = por %p54_p5, %p53_p3  ;;  %p125_p10 = scmp.eq.s32.totalorder %s397_s19, 1 }
   0xe   : > { %p663_p9 = por %p119_p6, %p47_p1  ;;  %p399_p12 = scmp.ge.s32.totalorder %s589_s17, 2 }
   0xf   : > { %s668_s26 = scalar_select %p38_p7, %s577_s14, %s40_s21  }
  0x10   : > { %p670_p11 = por %p125_p10, %p53_p3  ;;  %p422_p13 = scmp.lt.s32.totalorder %s589_s17, 2 }
  0x11   : > { %s151_s28 = sand.u32 1, %s577_s14   ;;  %s401_s30 = sshll.u32 %s585_s16, 2 }
  0x12   : > { %s400_s29 = sshll.u32 %s151_s28, 2  ;;  %s160_s6 = scalar_lea.hbm %s742_s0, %s401_s30 }
  0x13   : > { %s155_s7 = scalar_lea.vmem [#allocation3], %s400_s29  ;;  %s162_s9 = sshll.u32 %s160_s6, 4  ;;  %s163_s9 = int_to_ptr.hbm [resolvable:$true] %s162_s9 }
  0x14   : > { %s164_s8 = sshll.u32 %s155_s7, 4  ;;  %p415_p0 = pnand %p422_p13, %p653_p4  ;;  %s165_s8 = int_to_ptr.vmem [resolvable:$true] %s164_s8 }
  0x15   : > { %p402_p1 = scmp.ge.s32.totalorder %s589_s17, 1  ;;  %p169_p2 = scmp.lt.s32.totalorder %s589_s17, 3 }
  0x16   : > { %s152_s10 = scalar_lea.sflag [#allocation4], %s151_s28 }
  0x17   : > { %417 = dma.hbm_to_vmem [thread:$0]  (!%p415_p0), %s163_s9, 64, %s165_s8, %s152_s10  }
  0x18   : > { %p170_p3 = pnand %p402_p1, %p169_p2 }
  0x19   : > { %s686_s11 = sand.u32 (!%p170_p3), 1, %s573_s13  }
  0x1a   : > { %173 = sbr.rel (%p170_p3) target bundleno = 695 (0x2b7), region = 32  ;;  %s403_s18 = sshll.u32 (!%p170_p3), %s686_s11, 2 }
  0x1b   : > { %s176_s19 = scalar_lea.sflag (!%p170_p3), [#allocation4], %s686_s11  ;;  %s179_s21 = scalar_lea.vmem (!%p170_p3), [#allocation3], %s403_s18 }
  0x1f   : > { %560 = dma.done.wait (%p659_p8), %s176_s19, 64  }
  0x20   : > { %562 = vsyncadd (%p659_p8), %s176_s19, 4294967232  ;;  %v591_v0 = vmov 0.0   ;;  %v208_v1 = vld [vmem:[%s179_s21] sm:$0xf]  ;;  %vm215_vm0 = vcmask 1043456   ;;  %v222_v7 = vlaneseq  ;;  %vm225_vm1 = vcmask 31744   ;;  %s317_s4 = scalar_lea.hbm %s745_s3, %s581_s15 }
  0x21   : > { %206 = vst [vmem:[#allocation2] sm:$0xf] %v591_v0  ;;  %v220_v6 = vld [vmem:[%s743_s1] sm:$0xf]  ;;  %vm257_vm2 = vcmask 1041408   ;;  %vm253_vm3 = vcmask 15360  }
  0x22   : > { %404 = vmatpush.msk.msra.mxu0 %vm215_vm0, %v220_v6  ;;  %v223_v8 = vand.u32 127, %v222_v7  ;;  %v252_v12 = vld [vmem:[%s744_s2] sm:$0x3]  ;;  %vm282_vm4 = vcmask 24576   ;;  %s201_s5 = scalar_lea.vmem [#allocation6], %s686_s11  ;;  %s321_s7 = sshll.u32 %s317_s4, 4  ;;  %s322_s7 = int_to_ptr.hbm [resolvable:$true] %s321_s7 }
  0x23   : > { %406 = vmatpush.msk.msra.mxu1 %vm257_vm2, %v252_v12  ;;  %s319_s6 = sshll.u32 %s201_s5, 4  ;;  %s309_s8 = scalar_lea.sflag [#allocation5], %s686_s11  ;;  %s320_s6 = int_to_ptr.vmem [resolvable:$true] %s319_s6 }
  0x24   : > { %s521_s9 = sshra.s32 %s322_s7, 4  ;;  %s527_s19 = scalar_lea.hbm %s745_s3, 2  ;;  %s522_s9 = int_to_ptr.hbm [resolvable:$true] %s521_s9 }
  0x25   : > { %s523_s15 = scalar_lea.hbm %s522_s9, 1  ;;  %p528_p7 = scmp.lt.s32.totalorder %s522_s9, %s745_s3 }
  0x26   : > { %p524_p4 = scmp.ne.s32.totalorder %s522_s9, %s523_s15  ;;  %p529_p8 = scmp.lt.s32.totalorder %s527_s19, %s523_s15 }
  0x28   : > { %v207_v2 = vld [vmem:[#allocation2] sm:$0xf]  ;;  %p525_p5 = pnand %p524_p4, %p663_p9  ;;  %p530_p10 = por %p529_p8, %p528_p7 }
  0x29   : > { %v209_v3 = vadd.f32 %v208_v1, %v207_v2 }
  0x2a   : > { %p526_p6 = pneg %p525_p5 }
  0x2b   : > { %210 = vst [vmem:[#allocation2] sm:$0xf] %v209_v3 }
  0x2c   : > { %p531_p13 = pnand %p530_p10, %p526_p6 }
  0x32   : > { %v214_v4 = vld [vmem:[#allocation2] sm:$0xf] }
  0x33   : > { %v216_v5 = vsel %vm215_vm0, %v214_v4, 0.0 }
  0x34   : > { %217 = vadd.xlane.f32.xlu0 %v216_v5 }
  0xa7   : > { %v218_v9 = vpop.xlane.xlu0 %217 }
  0xa8   : > { %v219_v10 = vmul.f32 0.015625, %v218_v9 }
  0xaa   : > { %v224_v11 = vperm.slane %v219_v10, %v223_v8 }
  0xac   : > { %405 = vmatmul.msk.f32.vlgmr.msra.gmra.mxu0 %vm225_vm1, %v224_v11 }
 0x129   : > { %v248_v13 = vpop.f32.mrf.mxu0 }
 0x12a   : > { %v251_v14 = vmax.f32 %v248_v13, 0.0 }
 0x12c   : > { %407 = vmatmul.msk.f32.vlgmr.msra.gmra.mxu1 %vm253_vm3, %v251_v14 }
 0x1a9   : > { %v278_v15 = vpop.f32.mrf.mxu1 }
 0x1aa   : > { %v281_v16 = vmul.f32 0.25, %v278_v15 }
 0x1ac   : > { %v283_v17 = vsel %vm282_vm4, %v281_v16, -inf }
 0x1ad   : > { %284 = vmax.xlane.f32.xlu0 %v283_v17 }
 0x220   : > { %v285_v18 = vpop.xlane.xlu0 %284 }
 0x221   : > { %v286_v19 = vsub.f32 %v281_v16, %v285_v18 }
 0x223   : > { %v287_v20 = vmul.f32 1.442695, %v286_v19 }
 0x225   : > { %473 = vpow2.f32 %v287_v20 }
 0x22b   : > { %v474_v21 = vpop.eup %473 }
 0x22c   : > { %v289_v22 = vsel %vm282_vm4, %v474_v21, 0.0 }
 0x22d   : > { %290 = vadd.xlane.f32.xlu1 %v289_v22 }
 0x2a0   : > { %v291_v23 = vpop.xlane.xlu1 %290 }
 0x2a1   : > { %475 = vrcp.f32 %v291_v23  ;;  %v303_v27 = vand.u32 2147483648, %v291_v23  ;;  %v301_v29 = vand.u32 2147483647, %v291_v23  ;;  %vm297_vm6 = vweird.f32 %v291_v23 }
 0x2a3   : > { %v304_v31 = vor.u32 1.1754944e-38, %v303_v27  ;;  %vm302_vm8 = vcmp.eq.f32.partialorder %v301_v29, 8.507059e+37 }
 0x2a7   : > { %v476_v24 = vpop.eup %475 }
 0x2a8   : > { %v293_v25 = vmul.f32 %v476_v24, %v291_v23  ;;  %vm298_vm5 = vweird.f32 %v476_v24 }
 0x2a9   : > { %vm299_vm7 = vmor %vm297_vm6, %vm298_vm5 }
 0x2aa   : > { %v294_v26 = vsub.f32 1.0, %v293_v25 }
 0x2ac   : > { %v295_v28 = vmul.f32 %v476_v24, %v294_v26 }
 0x2ae   : > { %v296_v30 = vadd.f32 %v476_v24, %v295_v28 }
 0x2b0   : > { %v300_v32 = vsel %vm299_vm7, %v476_v24, %v296_v30 }
 0x2b1   : > { %v305_v33 = vsel %vm302_vm8, %v304_v31, %v300_v32 }
 0x2b2   : > { %v306_v34 = vmul.f32 %v474_v21, %v305_v33 }
 0x2b4   : > { %307 = vst.msk [vmem:[%s201_s5] sm:$0x1] %vm282_vm4, %v306_v34 }
 0x2b5   : > { %534 = shalt.err (!%p531_p13)
}
 0x2b6   : > { %412 = dma.vmem_to_hbm [thread:$0]  (%p663_p9), %s320_s6, 16, %s322_s7, %s309_s8  }
 0x2b7 PF: > { %s333_s11 = sand.u32 1, %s569_s12   ;;  %p419_p0 = pnand %p399_p12, %p670_p11 }
 0x2b8   : > { %s334_s23 = scalar_lea.sflag [#allocation5], %s333_s11 }
 0x2b9   : > { %p420_p1 = pneg %p419_p0 }
 0x2bb   : > { %564 = dma.done.wait (%p420_p1), %s334_s23, 16  }
 0x2bc   : > { %566 = vsyncadd (%p420_p1), %s334_s23, 4294967280  ;;  %s19_s17 = sadd.s32 1, %s589_s17   ;;  %s750_s12 = smov %s573_s13 }
 0x2bd   : > { %p16_p2 = scmp.ge.s32.totalorder %s19_s17, 4   ;;  %s751_s13 = smov %s577_s14 }
 0x2be   : > { %s752_s14 = smov %s668_s26  ;;  %s753_s15 = smov %s585_s16 }
 0x2bf   : > { %s754_s16 = smov %s756_s20  ;;  %18 = sbr.rel (!%p16_p2) target bundleno = 6 (0x6), region = 85 }
 0x2c4   :  { %339 = vsyncpa [#allocation4], 1 }
 0x2c5   :  { %341 = vsyncpa [#allocation4 + $0x1], 1 }
 0x2c6   :  { %342 = vsyncpa [#allocation5], 1 }
 0x2c7   :  { %344 = vsyncpa [#allocation5 + $0x1], 1 }

</bundles_post_ra>
